<compile_context>
chip_gen: v5e
topology: v5e:2x2
jax: 0.10.0
libtpu: 0.0.40
codegen_flags: <defaults>
</compile_context>

<pallas_src>
import jax
import jax.numpy as jnp
from jax.experimental import pallas as pl
from jax.experimental.pallas import tpu as pltpu


# ----------------------------- Pallas kernel -------------------------------
def _make_fused_kernel(n_slabs, slab_dims):
    """out_tile = sum_i x_i_tile @ W_i + b_eff   (layers pre-folded)."""

    def kernel(*refs):
        x_refs = refs[:n_slabs]
        w_refs = refs[n_slabs:2 * n_slabs]
        b_ref = refs[2 * n_slabs]
        o_ref = refs[2 * n_slabs + 1]

        acc = jnp.broadcast_to(b_ref[...], o_ref.shape).astype(jnp.float32)
        for i in range(n_slabs):
            x_i = x_refs[i][...]
            w_i = w_refs[i][...]
            if slab_dims[i] == 1:
                # K == 1 contraction (numeric features): broadcasted mul on VPU.
                acc = acc + x_i * w_i
            else:
                acc = acc + jnp.dot(x_i, w_i,
                                    preferred_element_type=jnp.float32)
        o_ref[...] = acc.astype(o_ref.dtype)

    return kernel


def mlp_pallas(slabs, w1, b1, w2, b2, *, tb_target=512):
    """slabs: list of (B, F_i) f32; w1: (H, F); b1: (H,); w2: (O, H); b2: (O,)."""
    B = slabs[0].shape[0]
    slab_dims = tuple(int(s.shape[1]) for s in slabs)
    O = int(w2.shape[0])

    # Fold the two linear layers (no nonlinearity in the reference forward).
    w_eff = jnp.dot(w1.T, w2.T)                        # (F, O)
    b_eff = (jnp.dot(b1, w2.T) + b2).reshape(1, O)     # (1, O)

    # Per-slab slices of the folded weight (so the concat never materializes).
    w_slabs = []
    off = 0
    for fi in slab_dims:
        w_slabs.append(w_eff[off:off + fi, :])
        off += fi

    # Batch tiling: one block for small B, else tiles of tb_target rows.
    if B <= tb_target:
        TB, B_pad = B, B
    else:
        TB = tb_target
        B_pad = pl.cdiv(B, TB) * TB
    if B_pad != B:
        slabs = [jnp.pad(s, ((0, B_pad - B), (0, 0))) for s in slabs]

    n = len(slabs)
    in_specs = (
        [pl.BlockSpec((TB, fi), lambda i: (i, 0)) for fi in slab_dims]      # x tiles
        + [pl.BlockSpec((fi, O), lambda i: (0, 0)) for fi in slab_dims]     # weights (resident)
        + [pl.BlockSpec((1, O), lambda i: (0, 0))]                          # bias (resident)
    )
    out_spec = pl.BlockSpec((TB, O), lambda i: (i, 0))

    # VMEM budget from tile sizes (double-buffered I/O tiles + weights),
    # with headroom; stays well under v7x's 64 MiB per-TC VMEM.
    itemsize = 4
    vmem_needed = (
        2 * sum(TB * fi for fi in slab_dims) * itemsize   # input tiles, 2 bufs
        + 2 * sum(fi * O for fi in slab_dims) * itemsize  # weight slices
        + 2 * O * itemsize                                # bias
        + 2 * TB * O * itemsize                           # output tiles, 2 bufs
    )
    vmem_limit = int(min(max(2 * vmem_needed, 32 << 20), 48 << 20))

    out = pl.pallas_call(
        _make_fused_kernel(n, slab_dims),
        out_shape=jax.ShapeDtypeStruct((B_pad, O), jnp.float32),
        grid=(B_pad // TB,),
        in_specs=in_specs,
        out_specs=out_spec,
        compiler_params=pltpu.CompilerParams(
            dimension_semantics=("parallel",),   # shards batch tiles on v7x's 2 TCs
            vmem_limit_bytes=vmem_limit,
        ),
    )(*slabs, *w_slabs, b_eff)

    return out[:B] if B_pad != B else out


# ------------------------------ Module glue --------------------------------
class MLPParams:
    def __init__(self, key, output_dim=2, additional_features=1, hidden_dim=32,
                 zoom=(15,), image_source=("opentopomap",), resize_size=8):
        self.zoom = list(zoom)
        self.image_source = list(image_source)
        self.additional_features = additional_features
        self.resize_size = resize_size
        self.input_img_dim = 3 * resize_size * resize_size
        in_dim = (self.input_img_dim * len(self.image_source) * len(self.zoom)
                  + additional_features)
        k1, k2, k3, k4 = jax.random.split(key, 4)
        # deterministic (PyTorch-Linear-like uniform) init
        bound1 = 1.0 / (in_dim ** 0.5)
        bound2 = 1.0 / (hidden_dim ** 0.5)
        self.w1 = jax.random.uniform(k1, (hidden_dim, in_dim), jnp.float32,
                                     -bound1, bound1)
        self.b1 = jax.random.uniform(k2, (hidden_dim,), jnp.float32,
                                     -bound1, bound1)
        self.w2 = jax.random.uniform(k3, (output_dim, hidden_dim), jnp.float32,
                                     -bound2, bound2)
        self.b2 = jax.random.uniform(k4, (output_dim,), jnp.float32,
                                     -bound2, bound2)

    def forward(self, batch_data):
        slabs = []
        for src in self.image_source:
            for z in self.zoom:
                d = batch_data[f"images_src_{src}_z_{z}"]          # (B,3,H,W) NCHW
                slabs.append(d.reshape(-1, self.input_img_dim))
        slabs.append(batch_data["numeric_features"].reshape(
            -1, self.additional_features))
        return mlp_pallas(slabs, self.w1, self.b1, self.w2, self.b2)


# ------------------------------- Reference ---------------------------------
def reference_forward(params, batch_data):
    image_data = []
    for src in params.image_source:
        for z in params.zoom:
            d = batch_data[f"images_src_{src}_z_{z}"]
            image_data.append(d.reshape(-1, params.input_img_dim))
    x_numeric = batch_data["numeric_features"].reshape(
        -1, params.additional_features)
    x = jnp.concatenate([*image_data, x_numeric], axis=1)
    h = x @ params.w1.T + params.b1
    return h @ params.w2.T + params.b2


if __name__ == "__main__":
    key = jax.random.PRNGKey(0)
    kp, kx, kn = jax.random.split(key, 3)

    B = 2
    resize = 8          # small spatial size for the synthetic test
    hidden = 32
    out_dim = 2
    add_feats = 1

    params = MLPParams(kp, output_dim=out_dim, additional_features=add_feats,
                       hidden_dim=hidden, zoom=[15],
                       image_source=["opentopomap"], resize_size=resize)

    batch_data = {
        "images_src_opentopomap_z_15":
            jax.random.normal(kx, (B, 3, resize, resize), jnp.float32),
        "numeric_features":
            jax.random.normal(kn, (B, add_feats), jnp.float32),
    }

    out = params.forward(batch_data)
    out = jax.block_until_ready(out)

    ref = reference_forward(params, batch_data)
    assert out.shape == (B, out_dim)
    assert jnp.allclose(out, ref, atol=1e-4, rtol=1e-4)

    print("KERNEL_OK")
</pallas_src>

<mosaic_0001>
module attributes {stable_mosaic.version = 11 : i64} {
  func.func @kernel(%arg0: i32, %arg1: memref<2x192xf32, #tpu.memory_space<vmem>>, %arg2: memref<2x1xf32, #tpu.memory_space<vmem>>, %arg3: memref<192x2xf32, #tpu.memory_space<vmem>>, %arg4: memref<1x2xf32, #tpu.memory_space<vmem>>, %arg5: memref<1x2xf32, #tpu.memory_space<vmem>>, %arg6: memref<2x2xf32, #tpu.memory_space<vmem>>) attributes {dimension_semantics = [#tpu.dimension_semantics<parallel>], iteration_bounds = array<i64: 1>, scalar_prefetch = 0 : i64, scratch_operands = 0 : i64, tpu.core_type = #tpu.core_type<tc>, window_params = [{transform_indices = @transform_0, window_bounds = array<i64: 2, 192>}, {transform_indices = @transform_1, window_bounds = array<i64: 2, 1>}, {pipeline_mode = #tpu.pipeline_mode<synchronous>, transform_indices = @transform_2, window_bounds = array<i64: 192, 2>}, {pipeline_mode = #tpu.pipeline_mode<synchronous>, transform_indices = @transform_3, window_bounds = array<i64: 1, 2>}, {pipeline_mode = #tpu.pipeline_mode<synchronous>, transform_indices = @transform_4, window_bounds = array<i64: 1, 2>}, {transform_indices = @transform_5, window_bounds = array<i64: 2, 2>}]} {
    %c0 = arith.constant 0 : index
    %c0_0 = arith.constant 0 : index
    %0 = vector.load %arg5[%c0, %c0_0] : memref<1x2xf32, #tpu.memory_space<vmem>>, vector<1x2xf32>
    %1 = vector.shape_cast %0 : vector<1x2xf32> to vector<1x2xf32>
    %2 = vector.broadcast %1 : vector<1x2xf32> to vector<2x2xf32>
    %c0_1 = arith.constant 0 : index
    %c0_2 = arith.constant 0 : index
    %3 = vector.load %arg1[%c0_1, %c0_2] : memref<2x192xf32, #tpu.memory_space<vmem>>, vector<2x192xf32>
    %c0_3 = arith.constant 0 : index
    %c0_4 = arith.constant 0 : index
    %4 = vector.load %arg3[%c0_3, %c0_4] : memref<192x2xf32, #tpu.memory_space<vmem>>, vector<192x2xf32>
    %cst = arith.constant dense<0.000000e+00> : vector<2x2xf32>
    %5 = tpu.matmul %3, %4, %cst {dimension_numbers = #tpu.dot_dimension_numbers<[1], [0], [0], [1], [0, 0, 1, 1], [], []>} : vector<2x192xf32>, vector<192x2xf32>, vector<2x2xf32> -> vector<2x2xf32>
    %6 = arith.addf %2, %5 : vector<2x2xf32>
    %c0_5 = arith.constant 0 : index
    %c0_6 = arith.constant 0 : index
    %7 = vector.load %arg2[%c0_5, %c0_6] : memref<2x1xf32, #tpu.memory_space<vmem>>, vector<2x1xf32>
    %c0_7 = arith.constant 0 : index
    %c0_8 = arith.constant 0 : index
    %8 = vector.load %arg4[%c0_7, %c0_8] : memref<1x2xf32, #tpu.memory_space<vmem>>, vector<1x2xf32>
    %9 = vector.broadcast %7 : vector<2x1xf32> to vector<2x2xf32>
    %10 = vector.broadcast %8 : vector<1x2xf32> to vector<2x2xf32>
    %11 = arith.mulf %9, %10 : vector<2x2xf32>
    %12 = arith.addf %6, %11 : vector<2x2xf32>
    %c0_9 = arith.constant 0 : index
    %c0_10 = arith.constant 0 : index
    %13 = vector.load %arg6[%c0_9, %c0_10] : memref<2x2xf32, #tpu.memory_space<vmem>>, vector<2x2xf32>
    tpu.vector_store %arg6[%c0_9, %c0_10], %12 {strides = array<i32>} : memref<2x2xf32, #tpu.memory_space<vmem>>, vector<2x2xf32>,
    return
  }
  func.func @transform_0(%arg0: i32) -> (i32, i32) {
    %c0_i32 = arith.constant 0 : i32
    %c0_i32_0 = arith.constant 0 : i32
    return %arg0, %c0_i32 : i32, i32
  }
  func.func @transform_1(%arg0: i32) -> (i32, i32) {
    %c0_i32 = arith.constant 0 : i32
    %c0_i32_0 = arith.constant 0 : i32
    return %arg0, %c0_i32 : i32, i32
  }
  func.func @transform_2(%arg0: i32) -> (i32, i32) {
    %c0_i32 = arith.constant 0 : i32
    %c0_i32_0 = arith.constant 0 : i32
    %c0_i32_1 = arith.constant 0 : i32
    return %c0_i32, %c0_i32_0 : i32, i32
  }
  func.func @transform_3(%arg0: i32) -> (i32, i32) {
    %c0_i32 = arith.constant 0 : i32
    %c0_i32_0 = arith.constant 0 : i32
    %c0_i32_1 = arith.constant 0 : i32
    return %c0_i32, %c0_i32_0 : i32, i32
  }
  func.func @transform_4(%arg0: i32) -> (i32, i32) {
    %c0_i32 = arith.constant 0 : i32
    %c0_i32_0 = arith.constant 0 : i32
    %c0_i32_1 = arith.constant 0 : i32
    return %c0_i32, %c0_i32_0 : i32, i32
  }
  func.func @transform_5(%arg0: i32) -> (i32, i32) {
    %c0_i32 = arith.constant 0 : i32
    %c0_i32_0 = arith.constant 0 : i32
    return %arg0, %c0_i32 : i32, i32
  }
}

</mosaic_0001>

<bundles_post_ra>
// kernel: tpu_custom_call.1
= control target key start
LH: loop header
LB: loop body
LE: loop exit
PB: predicated region body
PF: predicated region fallthrough
CT: control target
= control target key end

     0   :  { %v161_v2 = vmov 0   ;;  %s280_s0 = inlined_call_operand.vmem [shape: f32[2,192], index: 0, kind: input, shape index: {}]   ;;  %s281_s1 = inlined_call_operand.vmem [shape: f32[2,1], index: 1, kind: input, shape index: {}]   ;;  %s282_s2 = inlined_call_operand.vmem [shape: f32[192,2], index: 2, kind: input, shape index: {}]   ;;  %s283_s3 = inlined_call_operand.vmem [shape: f32[1,2], index: 3, kind: input, shape index: {}]   ;;  %s284_s4 = inlined_call_operand.vmem [shape: f32[1,2], index: 4, kind: input, shape index: {}]   ;;  %s285_s5 = inlined_call_operand.hbm [shape: f32[2,2], index: 5, kind: output, shape index: {}]  }
   0x1   :  { %v41_v0 = vld [vmem:[%s282_s2 + $0x78] sm:$0xff]  ;;  %v40_v1 = vld [vmem:[%s282_s2 + $0x70] sm:$0xff]  ;;  %132 = vset.pattern.permute.xlu0 %v161_v2  ;;  %v39_v3 = vld [vmem:[%s282_s2 + $0x68] sm:$0xff] }
   0x2   :  { %58 = vmatpush.msra.mxu0 %v41_v0  ;;  %v49_v4 = vld [vmem:[%s282_s2 + $0xb8] sm:$0xff]  ;;  %v48_v5 = vld [vmem:[%s282_s2 + $0xb0] sm:$0xff]  ;;  %v38_v6 = vld [vmem:[%s282_s2 + $0x60] sm:$0xff] }
   0x3   :  { %86 = vmatpush.msra.mxu1 %v49_v4  ;;  %v47_v7 = vld [vmem:[%s282_s2 + $0xa8] sm:$0xff]  ;;  %v37_v8 = vld [vmem:[%s282_s2 + $0x58] sm:$0xff]  ;;  %v36_v9 = vld [vmem:[%s282_s2 + $0x50] sm:$0xff] }
   0x4   :  { %59 = vmatpush.msra.mxu0 %v40_v1  ;;  %v46_v10 = vld [vmem:[%s282_s2 + $0xa0] sm:$0xff]  ;;  %v45_v11 = vld [vmem:[%s282_s2 + $0x98] sm:$0xff] }
   0x5   :  { %87 = vmatpush.msra.mxu1 %v48_v5  ;;  %v25_v12 = vld [vmem:[%s280_s0] sm:$0xf] }
   0x6   :  { %60 = vmatpush.msra.mxu0 %v39_v3  ;;  %v99_v13 = vld [vmem:[%s281_s1] sm:$0x3]  ;;  %51 = vst [vmem:[#allocation1] ss:$4 sm:$0xff] %v25_v12 }
   0x7   :  { %88 = vmatpush.msra.mxu1 %v47_v7  ;;  %103 = vperm.xlu0 %132, %v99_v13  }
   0x8   :  { %61 = vmatpush.msra.mxu0 %v38_v6 }
   0xa   :  { %62 = vmatpush.msra.mxu0 %v37_v8 }
   0xb   :  { %10 = vsyncpa [#allocation3], 0  ;;  %v35_v14 = vld [vmem:[%s282_s2 + $0x48] sm:$0xff]  ;;  %89 = vmatpush.msra.mxu1 %v46_v10  ;;  %v44_v15 = vld [vmem:[%s282_s2 + $0x90] sm:$0xff]  ;;  %vm55_vm0 = vcmask 523264   ;;  %s162_s22 = smov [#allocation2]  }
   0xc   :  { %63 = vmatpush.msra.mxu0 %v36_v9  ;;  %v34_v16 = vld [vmem:[%s282_s2 + $0x40] sm:$0xff]  ;;  %v43_v17 = vld [vmem:[%s282_s2 + $0x88] sm:$0xff]  ;;  %v33_v18 = vld [vmem:[%s282_s2 + $0x38] sm:$0xff]  ;;  %s118_s23 = sshll.u32 %s162_s22, 4  ;;  %s120_s1 = sshll.u32 %s285_s5, 4  ;;  %vm111_vm1 = vcmask 9216   ;;  %s119_s23 = int_to_ptr.vmem [resolvable:$true] %s118_s23  ;;  %s121_s1 = int_to_ptr.hbm [resolvable:$true] %s120_s1 }
   0xd   :  { %90 = vmatpush.msra.mxu1 %v45_v11  ;;  %v42_v19 = vld [vmem:[%s282_s2 + $0x80] sm:$0xff]  ;;  %v32_v20 = vld [vmem:[%s282_s2 + $0x30] sm:$0xff]  ;;  %v53_v21 = vld.sshfl [vmem:[#allocation1 + $0x8] sm:$0xff pattern:$0x73625140] }
   0xe   :  { %64 = vmatpush.msra.mxu0 %v35_v14  ;;  %v31_v22 = vld [vmem:[%s282_s2 + $0x28] sm:$0xff]  ;;  %v30_v23 = vld [vmem:[%s282_s2 + $0x20] sm:$0xff]  ;;  %v29_v24 = vld [vmem:[%s282_s2 + $0x18] sm:$0xff] }
   0xf   :  { %91 = vmatpush.msra.mxu1 %v44_v15  ;;  %v28_v25 = vld [vmem:[%s282_s2 + $0x10] sm:$0xff]  ;;  %v27_v26 = vld [vmem:[%s282_s2 + $0x8] sm:$0xff]  ;;  %v26_v27 = vld [vmem:[%s282_s2] sm:$0xff] }
  0x10   :  { %65 = vmatpush.msra.mxu0 %v34_v16  ;;  %v52_v28 = vld.sshfl [vmem:[#allocation1] sm:$0xff pattern:$0x73625140] }
  0x11   :  { %92 = vmatpush.msra.mxu1 %v43_v17  ;;  %v134_v29 = vld [vmem:[%s283_s3] ss:$0 sm:$0xff] }
  0x12   :  { %66 = vmatpush.msra.mxu0 %v33_v18  ;;  %v133_v32 = vld [vmem:[%s284_s4] ss:$0 sm:$0xff] }
  0x13   :  { %93 = vmatpush.msra.mxu1 %v42_v19 }
  0x14   :  { %67 = vmatpush.msra.mxu0 %v32_v20  ;;  %129 = vmatmul.msk.f32.vlgmr.msra.gmra.mxu1 %vm55_vm0, %v53_v21 }
  0x16   :  { %68 = vmatpush.msra.mxu0 %v31_v22 }
  0x18   :  { %69 = vmatpush.msra.mxu0 %v30_v23 }
  0x1a   :  { %70 = vmatpush.msra.mxu0 %v29_v24 }
  0x1c   :  { %71 = vmatpush.msra.mxu0 %v28_v25 }
  0x1e   :  { %72 = vmatpush.msra.mxu0 %v27_v26 }
  0x20   :  { %73 = vmatpush.msra.mxu0 %v26_v27 }
  0x21   :  { %74 = vmatmul.f32.vlgmr.msra.gmra.mxu0 %v52_v28 }
  0x79   :  { %v104_v31 = vpop.permute.xlu0 %103 }
  0x7a   :  { %v109_v35 = vmul.f32 %v134_v29, %v104_v31 }
  0x91   :  { %v95_v30 = vpop.f32.mrf.mxu1 }
  0x9e   :  { %v75_v33 = vpop.f32.mrf.mxu0 }
  0x9f   :  { %v96_v34 = vadd.f32 %v95_v30, %v75_v33 }
  0xa1   :  { %v98_v36 = vadd.f32 %v133_v32, %v96_v34 }
  0xa3   :  { %v110_v37 = vadd.f32 %v109_v35, %v98_v36 }
  0xa5   :  { %112 = vst.msk [vmem:[#allocation2] sm:$0x3] %vm111_vm1, %v110_v37 }
  0xa6   :  { %123 = dma.vmem_to_hbm [thread:$0]  %s119_s23, 32, %s121_s1, [#allocation3]  }
  0xa7   :  { %159 = dma.done.wait [#allocation3], 32  }
  0xa8   :  { %160 = vsyncadd [#allocation3], 4294967264 }
  0xa9   :  { %128 = vsyncpa [#allocation3], 1 }

</bundles_post_ra>
